<compile_context>
chip_gen: v6e
topology: v6e:2x2x1
jax: 0.10.0
libtpu: 0.0.40
codegen_flags: <defaults>
</compile_context>

<pallas_src>
import functools

import jax
import jax.numpy as jnp
from jax.experimental import pallas as pl
from jax.experimental.pallas import tpu as pltpu


def _round_up(x, m):
    return ((x + m - 1) // m) * m


def dueling_dqn_kernel(
    x_ref,        # [TB, D_in]       bf16
    w_feat_ref,   # [D_in, H]        bf16
    b_feat_ref,   # [1, H]           f32
    w_va1_ref,    # [H, 2H]          bf16   (value|advantage hidden layers fused)
    b_va1_ref,    # [1, 2H]          f32
    w_head_ref,   # [2H, HEAD_PAD]   bf16   (block-diag fused value/advantage heads)
    b_head_ref,   # [1, HEAD_PAD]    f32
    q_ref,        # [TB, HEAD_PAD]   f32    (cols 0..A-1 hold Q, rest is lane padding)
    *,
    num_actions,
    head_pad,
):
    # feature_layer: Linear + ReLU (bf16 inputs, f32 accumulate on the MXU)
    feat = jnp.dot(x_ref[...], w_feat_ref[...], preferred_element_type=jnp.float32)
    feat = jnp.maximum(feat + b_feat_ref[...], 0.0)                    # [TB, H] f32

    # value & advantage hidden layers, fused into one [H, 2H] matmul
    hid = jnp.dot(feat.astype(jnp.bfloat16), w_va1_ref[...],
                  preferred_element_type=jnp.float32)
    hid = jnp.maximum(hid + b_va1_ref[...], 0.0)                       # [TB, 2H] = [v_h | a_h]

    # fused heads via a block-diagonal weight:
    #   rows 0..H-1   (v_h) -> column HEAD_PAD-1  (value)
    #   rows H..2H-1  (a_h) -> columns 0..A-1     (advantages)
    #   everything else is exactly zero (weights and bias).
    head = jnp.dot(hid.astype(jnp.bfloat16), w_head_ref[...],
                   preferred_element_type=jnp.float32)
    head = head + b_head_ref[...]                                      # [TB, HEAD_PAD]

    value = head[:, head_pad - 1:head_pad]                             # [TB, 1]
    # padded columns are exactly zero, so sum(head) = sum(advantages) + value
    adv_sum = jnp.sum(head, axis=1, keepdims=True) - value
    adv_mean = adv_sum * (1.0 / num_actions)

    # Q = V + (A - mean(A)); only columns 0..A-1 are meaningful (wrapper slices),
    # but the store is full-lane (128-wide) and therefore unmasked.
    q_ref[...] = (head + value - adv_mean).astype(q_ref.dtype)


def pack_params(p):
    """Fuse / pad / cast the per-layer params into the kernel's fused layout."""
    H = p["w_feat"].shape[1]
    A = p["w_a2"].shape[1]
    head_pad = max(128, _round_up(A + 1, 128))

    w_va1 = jnp.concatenate([p["w_v1"], p["w_a1"]], axis=1)            # [H, 2H]
    b_va1 = jnp.concatenate([p["b_v1"], p["b_a1"]], axis=1)            # [1, 2H]

    w_head = jnp.zeros((2 * H, head_pad), jnp.float32)
    w_head = w_head.at[H:, :A].set(p["w_a2"])                          # advantage head
    w_head = w_head.at[:H, head_pad - 1].set(p["w_v2"][:, 0])          # value head
    b_head = jnp.zeros((1, head_pad), jnp.float32)
    b_head = b_head.at[0, :A].set(p["b_a2"][0])
    b_head = b_head.at[0, head_pad - 1].set(p["b_v2"][0, 0])

    return dict(
        w_feat=p["w_feat"].astype(jnp.bfloat16),
        b_feat=p["b_feat"].astype(jnp.float32),
        w_va1=w_va1.astype(jnp.bfloat16),
        b_va1=b_va1.astype(jnp.float32),
        w_head=w_head.astype(jnp.bfloat16),
        b_head=b_head.astype(jnp.float32),
        num_actions=A,
        head_pad=head_pad,
        hidden=H,
    )


def dueling_dqn_forward(x, packed, *, block_batch=128):
    B, D_in = x.shape
    H = packed["hidden"]
    A = packed["num_actions"]
    head_pad = packed["head_pad"]

    # Batch tiling: weights stay resident (index_map -> (0,0)), batch is gridded.
    tb = min(block_batch, _round_up(max(B, 1), 8))
    b_pad = _round_up(B, tb)
    x_p = x.astype(jnp.bfloat16)
    if b_pad != B:
        x_p = jnp.pad(x_p, ((0, b_pad - B), (0, 0)))

    kernel = functools.partial(dueling_dqn_kernel,
                               num_actions=A, head_pad=head_pad)

    q_pad = pl.pallas_call(
        kernel,
        out_shape=jax.ShapeDtypeStruct((b_pad, head_pad), jnp.float32),
        grid=(b_pad // tb,),
        in_specs=[
            pl.BlockSpec((tb, D_in), lambda i: (i, 0)),          # x: tiled over batch
            pl.BlockSpec((D_in, H), lambda i: (0, 0)),           # weights: VMEM-resident
            pl.BlockSpec((1, H), lambda i: (0, 0)),
            pl.BlockSpec((H, 2 * H), lambda i: (0, 0)),
            pl.BlockSpec((1, 2 * H), lambda i: (0, 0)),
            pl.BlockSpec((2 * H, head_pad), lambda i: (0, 0)),
            pl.BlockSpec((1, head_pad), lambda i: (0, 0)),
        ],
        out_specs=pl.BlockSpec((tb, head_pad), lambda i: (i, 0)),
        compiler_params=pltpu.CompilerParams(
            dimension_semantics=("parallel",),                   # shard batch across TCs (v7x)
        ),
    )(x_p, packed["w_feat"], packed["b_feat"], packed["w_va1"],
      packed["b_va1"], packed["w_head"], packed["b_head"])

    return q_pad[:B, :A]


def init_params(key, input_dim, output_dim, hidden_dim):
    """Deterministic synthetic init (uniform, PyTorch-Linear-like scale)."""
    ks = jax.random.split(key, 10)

    def lin(kw, kb, fan_in, fan_out):
        bound = 1.0 / jnp.sqrt(fan_in)
        w = jax.random.uniform(kw, (fan_in, fan_out), jnp.float32, -bound, bound)
        b = jax.random.uniform(kb, (1, fan_out), jnp.float32, -bound, bound)
        return w, b

    w_feat, b_feat = lin(ks[0], ks[1], input_dim, hidden_dim)
    w_v1, b_v1 = lin(ks[2], ks[3], hidden_dim, hidden_dim)
    w_v2, b_v2 = lin(ks[4], ks[5], hidden_dim, 1)
    w_a1, b_a1 = lin(ks[6], ks[7], hidden_dim, hidden_dim)
    w_a2, b_a2 = lin(ks[8], ks[9], hidden_dim, output_dim)

    return dict(
        w_feat=w_feat, b_feat=b_feat,
        w_v1=w_v1, b_v1=b_v1,
        w_v2=w_v2, b_v2=b_v2,
        w_a1=w_a1, b_a1=b_a1,
        w_a2=w_a2, b_a2=b_a2,
    )


def reference_forward(x, p):
    feat = jnp.maximum(x @ p["w_feat"] + p["b_feat"], 0.0)
    v = jnp.maximum(feat @ p["w_v1"] + p["b_v1"], 0.0) @ p["w_v2"] + p["b_v2"]
    a = jnp.maximum(feat @ p["w_a1"] + p["b_a1"], 0.0) @ p["w_a2"] + p["b_a2"]
    return v + (a - a.mean(axis=1, keepdims=True))


if __name__ == "__main__":
    # Small shapes consistent with the module's forward: x is [batch, input_dim].
    batch, input_dim, output_dim, hidden_dim = 8, 32, 8, 128

    key = jax.random.PRNGKey(0)
    k_x, k_p = jax.random.split(key)
    x = jax.random.normal(k_x, (batch, input_dim), dtype=jnp.float32)
    params = init_params(k_p, input_dim, output_dim, hidden_dim)

    packed = pack_params(params)
    q = dueling_dqn_forward(x, packed)
    q = jax.block_until_ready(q)

    q_ref = reference_forward(x, params)   # f32 reference
    assert q.shape == (batch, output_dim)
    # bf16 weights/activations on the MXU -> looser tolerance vs the f32 reference.
    err = float(jnp.max(jnp.abs(q - q_ref)))
    assert jnp.allclose(q, q_ref, atol=5e-2, rtol=5e-2), err

    print("KERNEL_OK")
</pallas_src>

<mosaic_0001>
module attributes {stable_mosaic.version = 11 : i64} {
  func.func @dueling_dqn_kernel(%arg0: i32, %arg1: memref<8x32xbf16, #tpu.memory_space<vmem>>, %arg2: memref<32x128xbf16, #tpu.memory_space<vmem>>, %arg3: memref<1x128xf32, #tpu.memory_space<vmem>>, %arg4: memref<128x256xbf16, #tpu.memory_space<vmem>>, %arg5: memref<1x256xf32, #tpu.memory_space<vmem>>, %arg6: memref<256x128xbf16, #tpu.memory_space<vmem>>, %arg7: memref<1x128xf32, #tpu.memory_space<vmem>>, %arg8: memref<8x128xf32, #tpu.memory_space<vmem>>) attributes {dimension_semantics = [#tpu.dimension_semantics<parallel>], iteration_bounds = array<i64: 1>, scalar_prefetch = 0 : i64, scratch_operands = 0 : i64, tpu.core_type = #tpu.core_type<tc>, window_params = [{transform_indices = @transform_0, window_bounds = array<i64: 8, 32>}, {pipeline_mode = #tpu.pipeline_mode<synchronous>, transform_indices = @transform_1, window_bounds = array<i64: 32, 128>}, {pipeline_mode = #tpu.pipeline_mode<synchronous>, transform_indices = @transform_2, window_bounds = array<i64: 1, 128>}, {pipeline_mode = #tpu.pipeline_mode<synchronous>, transform_indices = @transform_3, window_bounds = array<i64: 128, 256>}, {pipeline_mode = #tpu.pipeline_mode<synchronous>, transform_indices = @transform_4, window_bounds = array<i64: 1, 256>}, {pipeline_mode = #tpu.pipeline_mode<synchronous>, transform_indices = @transform_5, window_bounds = array<i64: 256, 128>}, {pipeline_mode = #tpu.pipeline_mode<synchronous>, transform_indices = @transform_6, window_bounds = array<i64: 1, 128>}, {transform_indices = @transform_7, window_bounds = array<i64: 8, 128>}]} {
    %c0 = arith.constant 0 : index
    %c0_0 = arith.constant 0 : index
    %0 = vector.load %arg1[%c0, %c0_0] : memref<8x32xbf16, #tpu.memory_space<vmem>>, vector<8x32xbf16>
    %c0_1 = arith.constant 0 : index
    %c0_2 = arith.constant 0 : index
    %1 = vector.load %arg2[%c0_1, %c0_2] : memref<32x128xbf16, #tpu.memory_space<vmem>>, vector<32x128xbf16>
    %cst = arith.constant dense<0.000000e+00> : vector<8x128xf32>
    %2 = tpu.matmul %0, %1, %cst {dimension_numbers = #tpu.dot_dimension_numbers<[1], [0], [0], [1], [0, 0, 1, 1], [], []>} : vector<8x32xbf16>, vector<32x128xbf16>, vector<8x128xf32> -> vector<8x128xf32>
    %c0_3 = arith.constant 0 : index
    %c0_4 = arith.constant 0 : index
    %3 = vector.load %arg3[%c0_3, %c0_4] : memref<1x128xf32, #tpu.memory_space<vmem>>, vector<1x128xf32>
    %4 = vector.broadcast %3 : vector<1x128xf32> to vector<8x128xf32>
    %5 = arith.addf %2, %4 : vector<8x128xf32>
    %cst_5 = arith.constant 0.000000e+00 : f32
    %6 = vector.broadcast %cst_5 : f32 to vector<8x128xf32>
    %7 = arith.maximumf %5, %6 : vector<8x128xf32>
    %8 = arith.truncf %7 : vector<8x128xf32> to vector<8x128xbf16>
    %c0_6 = arith.constant 0 : index
    %c0_7 = arith.constant 0 : index
    %9 = vector.load %arg4[%c0_6, %c0_7] : memref<128x256xbf16, #tpu.memory_space<vmem>>, vector<128x256xbf16>
    %cst_8 = arith.constant dense<0.000000e+00> : vector<8x256xf32>
    %10 = tpu.matmul %8, %9, %cst_8 {dimension_numbers = #tpu.dot_dimension_numbers<[1], [0], [0], [1], [0, 0, 1, 1], [], []>} : vector<8x128xbf16>, vector<128x256xbf16>, vector<8x256xf32> -> vector<8x256xf32>
    %c0_9 = arith.constant 0 : index
    %c0_10 = arith.constant 0 : index
    %11 = vector.load %arg5[%c0_9, %c0_10] : memref<1x256xf32, #tpu.memory_space<vmem>>, vector<1x256xf32>
    %12 = vector.broadcast %11 : vector<1x256xf32> to vector<8x256xf32>
    %13 = arith.addf %10, %12 : vector<8x256xf32>
    %cst_11 = arith.constant 0.000000e+00 : f32
    %14 = vector.broadcast %cst_11 : f32 to vector<8x256xf32>
    %15 = arith.maximumf %13, %14 : vector<8x256xf32>
    %16 = arith.truncf %15 : vector<8x256xf32> to vector<8x256xbf16>
    %c0_12 = arith.constant 0 : index
    %c0_13 = arith.constant 0 : index
    %17 = vector.load %arg6[%c0_12, %c0_13] : memref<256x128xbf16, #tpu.memory_space<vmem>>, vector<256x128xbf16>
    %cst_14 = arith.constant dense<0.000000e+00> : vector<8x128xf32>
    %18 = tpu.matmul %16, %17, %cst_14 {dimension_numbers = #tpu.dot_dimension_numbers<[1], [0], [0], [1], [0, 0, 1, 1], [], []>} : vector<8x256xbf16>, vector<256x128xbf16>, vector<8x128xf32> -> vector<8x128xf32>
    %c0_15 = arith.constant 0 : index
    %c0_16 = arith.constant 0 : index
    %19 = vector.load %arg7[%c0_15, %c0_16] : memref<1x128xf32, #tpu.memory_space<vmem>>, vector<1x128xf32>
    %20 = vector.broadcast %19 : vector<1x128xf32> to vector<8x128xf32>
    %21 = arith.addf %18, %20 : vector<8x128xf32>
    %22 = vector.extract_strided_slice %21 {offsets = [0, 127], sizes = [8, 1], strides = [1, 1]} : vector<8x128xf32> to vector<8x1xf32>
    %cst_17 = arith.constant dense<0.000000e+00> : vector<8xf32>
    %23 = vector.multi_reduction <add>, %21, %cst_17 [1] : vector<8x128xf32> to vector<8xf32>
    %24 = vector.shape_cast %23 : vector<8xf32> to vector<8x1xf32>
    %25 = arith.subf %24, %22 : vector<8x1xf32>
    %cst_18 = arith.constant 1.250000e-01 : f32
    %26 = vector.broadcast %cst_18 : f32 to vector<8x1xf32>
    %27 = arith.mulf %25, %26 : vector<8x1xf32>
    %28 = vector.broadcast %22 : vector<8x1xf32> to vector<8x128xf32>
    %29 = arith.addf %21, %28 : vector<8x128xf32>
    %30 = vector.broadcast %27 : vector<8x1xf32> to vector<8x128xf32>
    %31 = arith.subf %29, %30 : vector<8x128xf32>
    %c0_19 = arith.constant 0 : index
    %c0_20 = arith.constant 0 : index
    %32 = vector.load %arg8[%c0_19, %c0_20] : memref<8x128xf32, #tpu.memory_space<vmem>>, vector<8x128xf32>
    tpu.vector_store %arg8[%c0_19, %c0_20], %31 {strides = array<i32>} : memref<8x128xf32, #tpu.memory_space<vmem>>, vector<8x128xf32>,
    return
  }
  func.func @transform_0(%arg0: i32) -> (i32, i32) {
    %c0_i32 = arith.constant 0 : i32
    %c0_i32_0 = arith.constant 0 : i32
    return %arg0, %c0_i32 : i32, i32
  }
  func.func @transform_1(%arg0: i32) -> (i32, i32) {
    %c0_i32 = arith.constant 0 : i32
    %c0_i32_0 = arith.constant 0 : i32
    %c0_i32_1 = arith.constant 0 : i32
    return %c0_i32, %c0_i32_0 : i32, i32
  }
  func.func @transform_2(%arg0: i32) -> (i32, i32) {
    %c0_i32 = arith.constant 0 : i32
    %c0_i32_0 = arith.constant 0 : i32
    %c0_i32_1 = arith.constant 0 : i32
    return %c0_i32, %c0_i32_0 : i32, i32
  }
  func.func @transform_3(%arg0: i32) -> (i32, i32) {
    %c0_i32 = arith.constant 0 : i32
    %c0_i32_0 = arith.constant 0 : i32
    %c0_i32_1 = arith.constant 0 : i32
    return %c0_i32, %c0_i32_0 : i32, i32
  }
  func.func @transform_4(%arg0: i32) -> (i32, i32) {
    %c0_i32 = arith.constant 0 : i32
    %c0_i32_0 = arith.constant 0 : i32
    %c0_i32_1 = arith.constant 0 : i32
    return %c0_i32, %c0_i32_0 : i32, i32
  }
  func.func @transform_5(%arg0: i32) -> (i32, i32) {
    %c0_i32 = arith.constant 0 : i32
    %c0_i32_0 = arith.constant 0 : i32
    %c0_i32_1 = arith.constant 0 : i32
    return %c0_i32, %c0_i32_0 : i32, i32
  }
  func.func @transform_6(%arg0: i32) -> (i32, i32) {
    %c0_i32 = arith.constant 0 : i32
    %c0_i32_0 = arith.constant 0 : i32
    %c0_i32_1 = arith.constant 0 : i32
    return %c0_i32, %c0_i32_0 : i32, i32
  }
  func.func @transform_7(%arg0: i32) -> (i32, i32) {
    %c0_i32 = arith.constant 0 : i32
    %c0_i32_0 = arith.constant 0 : i32
    return %arg0, %c0_i32 : i32, i32
  }
}

</mosaic_0001>

<bundles_post_ra>
// kernel: tpu_custom_call.1
= control target key start
LH: loop header
LB: loop body
LE: loop exit
PB: predicated region body
PF: predicated region fallthrough
CT: control target
= control target key end

     0   :  { %12 = vsyncpa [#allocation3], 0  ;;  %s831_s0 = inlined_call_operand.hbm [shape: bf16[8,32], index: 0, kind: input, shape index: {}]   ;;  %s832_s1 = inlined_call_operand.hbm [shape: bf16[32,128], index: 1, kind: input, shape index: {}]   ;;  %s833_s2 = inlined_call_operand.vmem [shape: f32[1,128], index: 2, kind: input, shape index: {}]   ;;  %s834_s3 = inlined_call_operand.hbm [shape: bf16[128,256], index: 3, kind: input, shape index: {}]   ;;  %s835_s4 = inlined_call_operand.vmem [shape: f32[1,256], index: 4, kind: input, shape index: {}]   ;;  %s836_s5 = inlined_call_operand.hbm [shape: bf16[256,128], index: 5, kind: input, shape index: {}]   ;;  %s837_s6 = inlined_call_operand.vmem [shape: f32[1,128], index: 6, kind: input, shape index: {}]   ;;  %s838_s7 = inlined_call_operand.hbm [shape: f32[8,128], index: 7, kind: output, shape index: {}]  }
   0x1   :  { %13 = vsyncpa [#allocation6], 0 }
   0x2   :  { %14 = vsyncpa [#allocation9], 0 }
   0x3   :  { %15 = vsyncpa [#allocation4], 0  ;;  %s748_s24 = smov [#allocation5]  }
   0x4   :  { %s31_s25 = sshll.u32 %s748_s24, 4  ;;  %s32_s25 = int_to_ptr.vmem [resolvable:$true] %s31_s25 }
   0x5   :  { %s648_s26 = scalar_lea.vmem %s32_s25, 256  ;;  %p653_p1 = scmp.lt.s32.totalorder %s32_s25, %s32_s25 }
   0x6   :  { %p649_p0 = scmp.ne.s32.totalorder %s32_s25, %s648_s26  ;;  %p654_p2 = scmp.lt.s32.totalorder %s648_s26, %s648_s26 }
   0x8   :  { %p655_p3 = por %p654_p2, %p653_p1 }
   0xa   :  { %p656_p4 = pnand %p655_p3, %p649_p0 }
   0xc   :  { %659 = shalt.err (!%p656_p4)
}
   0xd   :  { %s749_s27 = smov 64   ;;  %s750_s28 = smov 4  }
   0xe   :  { %37 = dma.hbm_to_vmem [thread:$0]  %s832_s1, 256, %s32_s25, [#allocation6], %s749_s27, %s749_s27, %s750_s28  }
   0xf   :  { %s751_s8 = smov [#allocation2]   ;;  %s752_s10 = smov [#allocation7]  }
  0x10   :  { %s22_s9 = sshll.u32 %s751_s8, 4  ;;  %s45_s11 = sshll.u32 %s752_s10, 4  ;;  %s23_s9 = int_to_ptr.vmem [resolvable:$true] %s22_s9  ;;  %s46_s11 = int_to_ptr.vmem [resolvable:$true] %s45_s11 }
  0x11   :  { %s668_s12 = scalar_lea.vmem %s23_s9, 64  ;;  %p673_p6 = scmp.lt.s32.totalorder %s23_s9, %s23_s9 }
  0x12   :  { %p669_p5 = scmp.ne.s32.totalorder %s23_s9, %s668_s12  ;;  %p674_p7 = scmp.lt.s32.totalorder %s668_s12, %s668_s12 }
  0x14   :  { %p675_p8 = por %p674_p7, %p673_p6 }
  0x16   :  { %p676_p9 = pnand %p675_p8, %p669_p5 }
  0x18   :  { %679 = shalt.err (!%p676_p9)
}
  0x19   :  { %25 = dma.hbm_to_vmem [thread:$0]  %s831_s0, 64, %s23_s9, [#allocation3]  }
  0x1a   :  { %s688_s15 = scalar_lea.vmem %s46_s11, 2048  ;;  %p693_p11 = scmp.lt.s32.totalorder %s46_s11, %s46_s11 }
  0x1b   :  { %p689_p10 = scmp.ne.s32.totalorder %s46_s11, %s688_s15  ;;  %p694_p12 = scmp.lt.s32.totalorder %s688_s15, %s688_s15 }
  0x1d   :  { %p695_p13 = por %p694_p12, %p693_p11 }
  0x1f   :  { %p696_p0 = pnand %p695_p13, %p689_p10 }
  0x21   :  { %699 = shalt.err (!%p696_p0)
}
  0x22   :  { %s753_s1 = smov 128   ;;  %s754_s16 = smov 8  }
  0x23   :  { %51 = dma.hbm_to_vmem [thread:$0]  %s834_s3, 2048, %s46_s11, [#allocation6], %s753_s1, %s753_s1, %s754_s16  }
  0x24   :  { %s755_s19 = smov [#allocation8]  }
  0x25   :  { %s59_s20 = sshll.u32 %s755_s19, 4  ;;  %s60_s20 = int_to_ptr.vmem [resolvable:$true] %s59_s20 }
  0x26   :  { %s708_s21 = scalar_lea.vmem %s60_s20, 2048  ;;  %p713_p2 = scmp.lt.s32.totalorder %s60_s20, %s60_s20 }
  0x27   :  { %p709_p1 = scmp.ne.s32.totalorder %s60_s20, %s708_s21  ;;  %p714_p3 = scmp.lt.s32.totalorder %s708_s21, %s708_s21 }
  0x29   :  { %p715_p4 = por %p714_p3, %p713_p2 }
  0x2b   :  { %p716_p5 = pnand %p715_p4, %p709_p1 }
  0x2d   :  { %719 = shalt.err (!%p716_p5)
}
  0x2e   :  { %65 = dma.hbm_to_vmem [thread:$0]  %s836_s5, 2048, %s60_s20, [#allocation9], %s749_s27, %s749_s27, %s750_s28  }
  0x2f   :  { %740 = dma.done.wait [#allocation3], 64  }
  0x30   :  { %741 = vsyncadd [#allocation3], 4294967232 }
  0x31   :  { %742 = dma.done.wait [#allocation6], 2304  }
  0x32   :  { %743 = vsyncadd [#allocation6], 4294964992 }
  0x33   :  { %744 = dma.done.wait [#allocation9], 2048  }
  0x34   :  { %745 = vsyncadd [#allocation9], 4294965248  ;;  %v756_v0 = vmov 0.0   ;;  %vm757_vm0 = vmmov 0   ;;  %v598_v1 = vld [vmem:[#allocation5 + $0x8] sm:$0xff]   ;;  %v599_v2 = vld [vmem:[#allocation5] sm:$0xff]   ;;  %v169_v45 = vlaneseq }
  0x35   :  { %575 = vmatprep.subr.bf16.mxu0 %v756_v0  ;;  %579 = vmatprep.mubr.msk.bf16.mxu0 %vm757_vm0, %v756_v0  ;;  %v600_v3 = vld [vmem:[#allocation7 + $0x74] ss:$8 sps:$4 sm:$0xff]   ;;  %v602_v4 = vld [vmem:[#allocation7 + $0x70] ss:$8 sps:$4 sm:$0xff]   ;;  %v603_v5 = vld [vmem:[#allocation7 + $0x64] ss:$8 sps:$4 sm:$0xff]  }
  0x36   :  { %576 = vmatpush3.bf16.msra.mxu0 %v598_v1  ;;  %v81_v6 = vld [vmem:[#allocation2] sm:$0xf]  ;;  %259 = vmatprep.subr.bf16.mxu1 %v600_v3  ;;  %vm105_vm1 = vcmask 261120   ;;  %v605_v7 = vld [vmem:[#allocation7 + $0x60] ss:$8 sps:$4 sm:$0xff]   ;;  %v758_v20 = vmov 0  }
  0x37   :  { %577 = vmatprep.subr.bf16.mxu0 %v756_v0  ;;  %260 = vmatpush1.bf16.msra.mxu1 %v602_v4  ;;  %v606_v8 = vld [vmem:[#allocation7 + $0x54] ss:$8 sps:$4 sm:$0xff]   ;;  %v608_v9 = vld [vmem:[#allocation7 + $0x50] ss:$8 sps:$4 sm:$0xff]   ;;  %v609_v10 = vld [vmem:[#allocation7 + $0x44] ss:$8 sps:$4 sm:$0xff]  }
  0x38   :  { %261 = vmatprep.subr.bf16.mxu1 %v603_v5  ;;  %v611_v11 = vld [vmem:[#allocation7 + $0x40] ss:$8 sps:$4 sm:$0xff]   ;;  %v612_v12 = vld [vmem:[#allocation7 + $0x34] ss:$8 sps:$4 sm:$0xff]   ;;  %v614_v13 = vld [vmem:[#allocation7 + $0x30] ss:$8 sps:$4 sm:$0xff]   ;;  %291 = vmatprep.mubr.bf16.mxu1 %v758_v20 }
  0x39   :  { %v615_v14 = vld [vmem:[#allocation7 + $0x24] ss:$8 sps:$4 sm:$0xff]   ;;  %v617_v15 = vld [vmem:[#allocation7 + $0x20] ss:$8 sps:$4 sm:$0xff]   ;;  %v618_v16 = vld [vmem:[#allocation7 + $0x14] ss:$8 sps:$4 sm:$0xff]  }
  0x3a   :  { %578 = vmatpush3.bf16.msra.mxu0 %v599_v2  ;;  %v620_v17 = vld [vmem:[#allocation7 + $0x10] ss:$8 sps:$4 sm:$0xff]   ;;  %v621_v18 = vld [vmem:[#allocation7 + $0x4] ss:$8 sps:$4 sm:$0xff]   ;;  %v623_v19 = vld [vmem:[#allocation7] ss:$8 sps:$4 sm:$0xff]  }
  0x3b   :  { %262 = vmatpush1.bf16.msra.mxu1 %v605_v7  ;;  %v624_v21 = vld [vmem:[#allocation8 + $0x78] sm:$0xff]   ;;  %v626_v23 = vld [vmem:[#allocation8 + $0x70] sm:$0xff]   ;;  %v628_v25 = vld [vmem:[#allocation8 + $0x68] sm:$0xff]   ;;  %v170_v46 = vshrl.u32 %v169_v45, 7  ;;  %v759_v62 = vmov 127   ;;  %s760_s25 = smov [#allocation10]  }
  0x3c   :  { %263 = vmatprep.subr.bf16.mxu1 %v606_v8  ;;  %v625_v22 = vld [vmem:[#allocation8 + $0x38] sm:$0xff]   ;;  %553 = vmatprep.subr.bf16.mxu0 %v624_v21  ;;  %v627_v24 = vld [vmem:[#allocation8 + $0x30] sm:$0xff]   ;;  %v629_v26 = vld [vmem:[#allocation8 + $0x28] sm:$0xff]   ;;  %s502_s26 = sshll.u32 %s760_s25, 4  ;;  %s503_s26 = int_to_ptr.vmem [resolvable:$true] %s502_s26 }
  0x3d   :  { %580 = vmatmul.mubr.msk.bf16.vlgmr.msra.gmra.mxu0 %vm105_vm1, %v81_v6  ;;  %v630_v27 = vld [vmem:[#allocation8 + $0x60] sm:$0xff]   ;;  %v632_v29 = vld [vmem:[#allocation8 + $0x58] sm:$0xff]   ;;  %v634_v31 = vld [vmem:[#allocation8 + $0x50] sm:$0xff]   ;;  %v171_v47 = vsub.s32 0, %v170_v46  ;;  %v175_v49 = vsub.s32 1, %v170_v46  ;;  %596 = vset.pattern.permute.xlu0 %v759_v62  ;;  %p725_p7 = scmp.lt.s32.totalorder %s503_s26, %s503_s26 }
  0x3e   :  { %554 = vmatpush3.bf16.msra.mxu0 %v625_v22  ;;  %v631_v28 = vld [vmem:[#allocation8 + $0x20] sm:$0xff]   ;;  %v633_v30 = vld [vmem:[#allocation8 + $0x18] sm:$0xff]   ;;  %v635_v32 = vld [vmem:[#allocation8 + $0x10] sm:$0xff]   ;;  %597 = vset.pattern.permute.xlu1 %v759_v62 }
  0x3f   :  { %264 = vmatpush1.bf16.msra.mxu1 %v608_v9  ;;  %555 = vmatprep.subr.bf16.mxu0 %v626_v23  ;;  %v513_v33 = vld [vmem:[%s833_s2] ss:$0 sm:$0xff]  ;;  %v638_v43 = vld [vmem:[#allocation8 + $0x40] sm:$0xff]  }
  0x40   :  { %265 = vmatprep.subr.bf16.mxu1 %v609_v10  ;;  %v636_v41 = vld [vmem:[#allocation8 + $0x48] sm:$0xff]   ;;  %v639_v44 = vld [vmem:[#allocation8] sm:$0xff]  }
  0x41   :  { %v637_v42 = vld [vmem:[#allocation8 + $0x8] sm:$0xff]  }
  0x42   :  { %556 = vmatpush3.bf16.msra.mxu0 %v627_v24  ;;  %v167_v48 = vld [vmem:[%s835_s4] sm:$0x3] }
  0x43   :  { %266 = vmatpush1.bf16.msra.mxu1 %v611_v11  ;;  %557 = vmatprep.subr.bf16.mxu0 %v628_v25  ;;  %v172_v50 = vrot.slane %v167_v48, %v171_v47  ;;  %v176_v51 = vrot.slane %v167_v48, %v175_v49  ;;  %v533_v0 = vld [vmem:[%s837_s6] ss:$0 sm:$0xff]  ;;  %s720_s6 = scalar_lea.vmem %s503_s26, 128 }
  0x44   :  { %267 = vmatprep.subr.bf16.mxu1 %v612_v12  ;;  %p721_p6 = scmp.ne.s32.totalorder %s503_s26, %s720_s6  ;;  %p726_p8 = scmp.lt.s32.totalorder %s720_s6, %s720_s6 }
  0x46   :  { %558 = vmatpush3.bf16.msra.mxu0 %v629_v26  ;;  %p727_p9 = por %p726_p8, %p725_p7 }
  0x47   :  { %268 = vmatpush1.bf16.msra.mxu1 %v614_v13  ;;  %559 = vmatprep.subr.bf16.mxu0 %v630_v27 }
  0x48   :  { %269 = vmatprep.subr.bf16.mxu1 %v615_v14  ;;  %p728_p10 = pnand %p727_p9, %p721_p6 }
  0x4a   :  { %560 = vmatpush3.bf16.msra.mxu0 %v631_v28 }
  0x4b   :  { %270 = vmatpush1.bf16.msra.mxu1 %v617_v15  ;;  %561 = vmatprep.subr.bf16.mxu0 %v632_v29 }
  0x4c   :  { %271 = vmatprep.subr.bf16.mxu1 %v618_v16 }
  0x4e   :  { %562 = vmatpush3.bf16.msra.mxu0 %v633_v30 }
  0x4f   :  { %272 = vmatpush1.bf16.msra.mxu1 %v620_v17  ;;  %563 = vmatprep.subr.bf16.mxu0 %v634_v31 }
  0x50   :  { %273 = vmatprep.subr.bf16.mxu1 %v621_v18 }
  0x52   :  { %564 = vmatpush3.bf16.msra.mxu0 %v635_v32 }
  0x53   :  { %274 = vmatpush1.bf16.msra.mxu1 %v623_v19  ;;  %565 = vmatprep.subr.bf16.mxu0 %v636_v41 }
  0x56   :  { %566 = vmatpush3.bf16.msra.mxu0 %v637_v42 }
  0x57   :  { %567 = vmatprep.subr.bf16.mxu0 %v638_v43 }
  0x5a   :  { %568 = vmatpush3.bf16.msra.mxu0 %v639_v44 }
  0xfd   :  { %v143_v34 = vpop.f32.mrf.mxu0 }
  0xfe   :  { %v144_v35 = vadd.f32 %v513_v33, %v143_v34 }
  0xff   :  { %v581_v36 = vpop.f32.mrf.mxu0 }
 0x100   :  { %v149_v37 = vmax.f32 %v144_v35, 0.0 }
 0x101   :  { %v146_v38 = vpop.f32.mrf.mxu0 }
 0x102   :  { %v150_v39 = vpack.c.bf16 %v149_v37, %v149_v37 }
 0x103   :  { %v582_v40 = vpop.f32.mrf.mxu0 }
 0x104   :  { %292 = vmatmul.mubr.bf16.vlgmr.msra.gmra.mxu1 %v150_v39 }
 0x1c4   :  { %v293_v52 = vpop.f32.mrf.mxu1 }
 0x1c5   :  { %v294_v53 = vadd.f32 %v293_v52, %v172_v50 }
 0x1c6   :  { %v295_v54 = vpop.f32.mrf.mxu1 }
 0x1c7   :  { %v296_v55 = vadd.f32 %v295_v54, %v176_v51  ;;  %v300_v56 = vmax.f32 %v294_v53, 0.0 }
 0x1c8   :  { %v297_v57 = vpop.f32.mrf.mxu1 }
 0x1c9   :  { %v301_v58 = vmax.f32 %v296_v55, 0.0  ;;  %v302_v61 = vpack.c.bf16 %v300_v56, %v300_v56 }
 0x1ca   :  { %v298_v59 = vpop.f32.mrf.mxu1 }
 0x1cb   :  { %v303_v60 = vpack.c.bf16 %v301_v58, %v301_v58 }
 0x1cd   :  { %471 = vmatprep.mubr.bf16.mxu0 %v303_v60 }
 0x1ce   :  { %472 = vmatmul.mubr.bf16.vlgmr.msra.gmra.mxu0 %v302_v61 }
 0x28e   :  { %v569_v63 = vpop.f32.mrf.mxu0 }
 0x290   :  { %v570_v1 = vpop.f32.mrf.mxu0 }
 0x291   :  { %v571_v2 = vadd.f32 %v570_v1, %v569_v63 }
 0x292   :  { %v572_v3 = vpop.f32.mrf.mxu0 }
 0x293   :  { %v474_v4 = vadd.f32 %v571_v2, %v533_v0 }
 0x294   :  { %v573_v5 = vpop.f32.mrf.mxu0 }
 0x295   :  { %479 = vadd.xlane.f32.xlu0 %v474_v4 }
 0x2ab   :  { %485 = vperm.xlu0 %596, %v474_v4  }
 0x31e   :  { %v480_v6 = vpop.xlane.xlu0 %479 }
 0x31f   :  { %v481_v7 = vsub.f32 %v480_v6, %v474_v4 }
 0x321   :  { %v482_v8 = vmul.f32 0.125, %v481_v7 }
 0x323   :  { %491 = vperm.xlu1 %597, %v482_v8  }
 0x326   :  { %v486_v9 = vpop.permute.xlu0 %485 }
 0x327   :  { %v488_v10 = vadd.f32 %v486_v9, %v474_v4 }
 0x39e   :  { %v492_v11 = vpop.permute.xlu1 %491 }
 0x39f   :  { %v494_v12 = vsub.f32 %v488_v10, %v492_v11 }
 0x3a1   :  { %495 = vst [vmem:[#allocation10] sm:$0xff] %v494_v12 }
 0x3a2   :  { %731 = shalt.err (!%p728_p10)
}
 0x3a3   :  { %505 = dma.vmem_to_hbm [thread:$0]  %s503_s26, 128, %s838_s7, [#allocation4]  }
 0x3a4   :  { %746 = dma.done.wait [#allocation4], 128  }
 0x3a5   :  { %747 = vsyncadd [#allocation4], 4294967168 }
 0x3a6   :  { %509 = vsyncpa [#allocation3], 1 }
 0x3a7   :  { %510 = vsyncpa [#allocation6], 1 }
 0x3a8   :  { %511 = vsyncpa [#allocation9], 1 }
 0x3a9   :  { %512 = vsyncpa [#allocation4], 1 }

</bundles_post_ra>
